<compile_context>
chip_gen: v5e
topology: v5e:2x2
jax: 0.10.0
libtpu: 0.0.40
codegen_flags: <defaults>
</compile_context>

<pallas_src>
import functools

import jax
import jax.numpy as jnp
from jax.experimental import pallas as pl
from jax.experimental.pallas import tpu as pltpu


def spconv_kernel(xm_ref, w_ref, b_ref, g_ref, be_ref, a_ref, out_ref, *,
                  Cin, H, W, block_b):
    # xm_ref  : (R, Nl)   rows [0:Cin] = x channels, rows [Cin:Cin+3] = border masks
    #                     (h>=1, h<=H-2, w>=1), rest zero pad.  Nl = block_b*H*W.
    # w_ref   : (C2, K6)  fused conv weight, K6 = KH*KW*Cin, tap-major rows.
    # b_ref   : (C2, 1)   conv bias (f32)
    # g_ref   : (C2, 1)   GroupNorm gamma repeated per conv channel (f32)
    # be_ref  : (C2, 1)   GroupNorm beta  repeated per conv channel (f32)
    # a_ref   : (1, 1)    shared PReLU slope (f32)
    # out_ref : (C2, Nl)  conv-channel-major, pre-shuffle output
    KH, KW = 3, 2
    HW = H * W
    Nl = block_b * HW
    C2 = w_ref.shape[0]

    xm = xm_ref[...]                          # one wide lane-dense load
    x = xm[0:Cin, :]                          # (Cin, Nl)
    m_h_ge1 = xm[Cin:Cin + 1, :]              # 1.0 where h >= 1      (top pad row)
    m_h_le = xm[Cin + 1:Cin + 2, :]           # 1.0 where h <= H - 2  (bottom pad row)
    m_w_ge1 = xm[Cin + 2:Cin + 3, :]          # 1.0 where w >= 1      (causal left pad)

    # ---- in-kernel im2col: 6 taps = XLU lane rolls + border-mask multiplies -----
    # tap(kh,kw)[l] = x[l + dh*W + dw] (dh=kh-1, dw=kw-1) with zero padding; any
    # cross-sample / wrap-around read lands on a lane the masks zero out.
    taps = []
    for kh in range(KH):
        for kw in range(KW):
            dh, dw = kh - 1, kw - 1
            shift = (-(dh * W + dw)) % Nl     # roll semantics: out[l] = x[(l - shift) % Nl]
            t = x if shift == 0 else pltpu.roll(x, shift, 1)
            if dh == -1:
                t = t * m_h_ge1
            elif dh == 1:
                t = t * m_h_le
            if dw == -1:
                t = t * m_w_ge1
            taps.append(t)
    patches = jnp.concatenate(taps, axis=0)   # (K6, Nl), matmul dtype

    # ---- causal conv: ONE fused MXU matmul over the whole lane slab -------------
    y = jnp.dot(w_ref[...], patches, preferred_element_type=jnp.float32)
    y = y + b_ref[...]                        # (C2, Nl) f32

    # ---- per-sample GroupNorm(1, C) + PReLU on 128-aligned lane slices ----------
    alpha = a_ref[0, 0]                       # invariant loads hoisted out of the loop
    gamma = g_ref[...]                        # (C2, 1)
    beta = be_ref[...]                        # (C2, 1)
    inv_count = 1.0 / float(C2 * HW)
    for i in range(block_b):                  # static, small (capped by the wrapper)
        yi = y[:, i * HW:(i + 1) * HW]        # (C2, HW) — HW is a multiple of 128
        s1 = jnp.sum(yi)
        s2 = jnp.sum(yi * yi)
        mean = s1 * inv_count
        var = jnp.maximum(s2 * inv_count - mean * mean, 0.0)   # clamp f32 cancellation
        inv_std = jax.lax.rsqrt(var + 1e-8)   # eps = 1e-8 per the module spec
        scale = gamma * inv_std
        shift = beta - mean * scale
        o = yi * scale + shift
        o = jnp.where(o >= 0.0, o, alpha * o)
        out_ref[:, i * HW:(i + 1) * HW] = o.astype(out_ref.dtype)


def _pick_block_b(B, per_sample_bytes, vmem_budget, prefer_two_steps, max_block=32):
    divs = [d for d in range(1, B + 1) if B % d == 0]
    ok = [d for d in divs if d <= max_block and d * per_sample_bytes <= vmem_budget]
    block_b = ok[-1] if ok else 1
    if prefer_two_steps and block_b == B and B % 2 == 0 and B > 1:
        # keep >= 2 grid steps so 2-TensorCore chips (v7x) can shard the batch axis;
        # on single-core v5e/v6e the extra step is only ~0.35us of overhead.
        block_b = B // 2
    return block_b


def spconv_pallas(x, weight, bias, gamma, beta, alpha, scale_factor=2,
                  matmul_dtype=jnp.bfloat16, block_b=None, out_dtype=jnp.float32,
                  vmem_budget_bytes=24 << 20, prefer_two_steps=True):
    B, Cin, H, W = x.shape
    C2, Cin_w, KH, KW = weight.shape
    assert (Cin_w, KH, KW) == (Cin, 3, 2), (Cin_w, KH, KW)
    n = scale_factor
    Cout = C2 // n
    assert Cout * n == C2
    # Commuting the shuffle out of the kernel requires GroupNorm(1, C) and a single
    # shared PReLU slope (as in the reference module).
    assert jnp.asarray(alpha).size == 1, "kernel assumes a single shared PReLU slope"

    HW = H * W
    K6 = KH * KW * Cin
    R = ((Cin + 3 + 7) // 8) * 8             # x rows + 3 mask rows, padded to x8

    in_bytes = jnp.dtype(matmul_dtype).itemsize
    out_bytes = jnp.dtype(out_dtype).itemsize
    per_sample = 2 * (R * HW * in_bytes + C2 * HW * out_bytes)  # double-buffered blocks
    if block_b is None:
        block_b = _pick_block_b(B, per_sample, vmem_budget_bytes, prefer_two_steps)
    assert B % block_b == 0, (B, block_b)
    grid_b = B // block_b

    # ---- wrapper glue (plain JAX, pure layout; NO im2col materialization) -------
    # lane layout: lane = b*HW + h*W + w  (H*W = multiple of 128 lanes)
    x_flat = jnp.transpose(x.reshape(B, Cin, HW), (1, 0, 2)).reshape(Cin, B * HW)
    h_idx = jnp.repeat(jnp.arange(H), W)
    w_idx = jnp.tile(jnp.arange(W), H)
    masks = jnp.stack([h_idx >= 1, h_idx <= H - 2, w_idx >= 1]).astype(matmul_dtype)
    masks = jnp.tile(masks, (1, B))                                   # (3, B*HW)
    pieces = [x_flat.astype(matmul_dtype), masks]
    if R - Cin - 3 > 0:
        pieces.append(jnp.zeros((R - Cin - 3, B * HW), matmul_dtype))
    xm = jnp.concatenate(pieces, axis=0)                              # (R, B*HW)

    # weight (C2, Cin, KH, KW) -> (C2, KH, KW, Cin) -> (C2, K6), matching tap order
    w2 = jnp.transpose(weight, (0, 2, 3, 1)).reshape(C2, K6).astype(matmul_dtype)
    b2 = bias.reshape(C2, 1).astype(jnp.float32)
    # GroupNorm affine at conv-channel granularity: conv channel c2 -> gamma[c2 // n]
    g2 = jnp.repeat(gamma.astype(jnp.float32), n).reshape(C2, 1)
    be2 = jnp.repeat(beta.astype(jnp.float32), n).reshape(C2, 1)
    a2 = jnp.asarray(alpha, jnp.float32).reshape(1, 1)

    kernel = functools.partial(spconv_kernel, Cin=Cin, H=H, W=W, block_b=block_b)
    # NOTE: the small grid-invariant operands (w2/b2/g2/be2/a2) could additionally be
    # single-buffered (pipeline_mode=pl.Buffered(1)) or moved to SMEM; negligible at
    # this size, so left default for robustness.
    out_flat = pl.pallas_call(
        kernel,
        out_shape=jax.ShapeDtypeStruct((C2, B * HW), out_dtype),
        grid_spec=pltpu.PrefetchScalarGridSpec(
            num_scalar_prefetch=0,
            grid=(grid_b,),
            in_specs=[
                pl.BlockSpec((R, block_b * HW), lambda b: (0, b)),
                pl.BlockSpec((C2, K6), lambda b: (0, 0)),
                pl.BlockSpec((C2, 1), lambda b: (0, 0)),
                pl.BlockSpec((C2, 1), lambda b: (0, 0)),
                pl.BlockSpec((C2, 1), lambda b: (0, 0)),
                pl.BlockSpec((1, 1), lambda b: (0, 0)),
            ],
            out_specs=pl.BlockSpec((C2, block_b * HW), lambda b: (0, b)),
        ),
        compiler_params=pltpu.CompilerParams(dimension_semantics=("parallel",)),
    )(xm, w2, b2, g2, be2, a2)

    # ---- sub-pixel shuffle as a single wrapper layout op ------------------------
    # out[b, c0, h*n + k, w] = out_flat[c0*n + k, b*HW + h*W + w]
    out = out_flat.reshape(Cout, n, B, H, W)
    out = jnp.transpose(out, (2, 0, 3, 1, 4)).reshape(B, Cout, H * n, W)
    return out


def spconv_reference(x, weight, bias, gamma, beta, alpha, scale_factor=2):
    """Plain-JAX mirror of the PyTorch forward, for correctness checking."""
    n = scale_factor
    xp = jnp.pad(x, ((0, 0), (0, 0), (0, 0), (1, 0)))               # causal W pad (left)
    y = jax.lax.conv_general_dilated(
        xp, weight, window_strides=(1, 1), padding=((1, 1), (0, 0)),
        dimension_numbers=("NCHW", "OIHW", "NCHW"),
        precision=jax.lax.Precision.HIGHEST)
    y = y + bias[None, :, None, None]
    B, C2, H, W = y.shape
    Cout = C2 // n
    p = jnp.transpose(y, (0, 3, 2, 1))                              # (B, W, H, C2)
    r = p.reshape(B, W, H, Cout, n)
    r = jnp.transpose(r, (0, 1, 2, 4, 3))
    r = r.reshape(B, W, H * n, Cout)
    r = jnp.transpose(r, (0, 3, 2, 1))                              # (B, Cout, H*n, W)
    mean = jnp.mean(r, axis=(1, 2, 3), keepdims=True)
    var = jnp.mean((r - mean) ** 2, axis=(1, 2, 3), keepdims=True)
    rn = (r - mean) / jnp.sqrt(var + 1e-8)
    out = rn * gamma[None, :, None, None] + beta[None, :, None, None]
    return jnp.where(out >= 0, out, alpha * out)


if __name__ == "__main__":
    B, Cin, H, W = 2, 4, 16, 16
    out_ch, n = 4, 2
    C2 = out_ch * n

    key = jax.random.PRNGKey(0)
    kx, kw, kb, kg, kbe = jax.random.split(key, 5)
    x = jax.random.normal(kx, (B, Cin, H, W), jnp.float32)
    weight = jax.random.normal(kw, (C2, Cin, 3, 2), jnp.float32) * 0.2   # Conv2d weight
    bias = jax.random.normal(kb, (C2,), jnp.float32) * 0.1               # Conv2d bias
    gamma = 1.0 + 0.1 * jax.random.normal(kg, (out_ch,), jnp.float32)    # GroupNorm weight
    beta = 0.05 * jax.random.normal(kbe, (out_ch,), jnp.float32)         # GroupNorm bias
    alpha = 0.25                                                         # PReLU init

    ref = spconv_reference(x, weight, bias, gamma, beta, alpha, scale_factor=n)

    # f32 MXU operands, 2 grid steps (block_b=1): tight tolerance vs all-f32 reference
    out_f32 = jax.block_until_ready(
        spconv_pallas(x, weight, bias, gamma, beta, alpha, scale_factor=n,
                      matmul_dtype=jnp.float32))
    assert out_f32.shape == (B, out_ch, H * n, W), out_f32.shape
    assert jnp.allclose(out_f32, ref, atol=5e-5, rtol=5e-5), \
        float(jnp.max(jnp.abs(out_f32 - ref)))

    # f32, single grid step (block_b=B): exercises multi-sample lane folding
    out_f32_one = jax.block_until_ready(
        spconv_pallas(x, weight, bias, gamma, beta, alpha, scale_factor=n,
                      matmul_dtype=jnp.float32, block_b=B))
    assert jnp.allclose(out_f32_one, ref, atol=5e-5, rtol=5e-5), \
        float(jnp.max(jnp.abs(out_f32_one - ref)))

    # default path: bf16 MXU operands (f32 accumulation + f32 post-conv math)
    out_bf16 = jax.block_until_ready(
        spconv_pallas(x, weight, bias, gamma, beta, alpha, scale_factor=n))
    assert jnp.allclose(out_bf16, ref, atol=3e-2, rtol=3e-2), \
        float(jnp.max(jnp.abs(out_bf16 - ref)))

    print("KERNEL_OK")
</pallas_src>

<mosaic_0001>
module attributes {stable_mosaic.version = 11 : i64} {
  func.func @spconv_kernel(%arg0: i32, %arg1: memref<8x256xf32, #tpu.memory_space<vmem>>, %arg2: memref<8x24xf32, #tpu.memory_space<vmem>>, %arg3: memref<8x1xf32, #tpu.memory_space<vmem>>, %arg4: memref<8x1xf32, #tpu.memory_space<vmem>>, %arg5: memref<8x1xf32, #tpu.memory_space<vmem>>, %arg6: memref<1x1xf32, #tpu.memory_space<vmem>>, %arg7: memref<8x256xf32, #tpu.memory_space<vmem>>) attributes {dimension_semantics = [#tpu.dimension_semantics<parallel>], iteration_bounds = array<i64: 2>, scalar_prefetch = 0 : i64, scratch_operands = 0 : i64, tpu.core_type = #tpu.core_type<tc>, window_params = [{transform_indices = @transform_0, window_bounds = array<i64: 8, 256>}, {pipeline_mode = #tpu.pipeline_mode<synchronous>, transform_indices = @transform_1, window_bounds = array<i64: 8, 24>}, {pipeline_mode = #tpu.pipeline_mode<synchronous>, transform_indices = @transform_2, window_bounds = array<i64: 8, 1>}, {pipeline_mode = #tpu.pipeline_mode<synchronous>, transform_indices = @transform_3, window_bounds = array<i64: 8, 1>}, {pipeline_mode = #tpu.pipeline_mode<synchronous>, transform_indices = @transform_4, window_bounds = array<i64: 8, 1>}, {pipeline_mode = #tpu.pipeline_mode<synchronous>, transform_indices = @transform_5, window_bounds = array<i64: 1, 1>}, {transform_indices = @transform_6, window_bounds = array<i64: 8, 256>}]} {
    %c0 = arith.constant 0 : index
    %c0_0 = arith.constant 0 : index
    %0 = vector.load %arg1[%c0, %c0_0] : memref<8x256xf32, #tpu.memory_space<vmem>>, vector<8x256xf32>
    %1 = vector.extract_strided_slice %0 {offsets = [0, 0], sizes = [4, 256], strides = [1, 1]} : vector<8x256xf32> to vector<4x256xf32>
    %2 = vector.extract_strided_slice %0 {offsets = [4, 0], sizes = [1, 256], strides = [1, 1]} : vector<8x256xf32> to vector<1x256xf32>
    %3 = vector.extract_strided_slice %0 {offsets = [5, 0], sizes = [1, 256], strides = [1, 1]} : vector<8x256xf32> to vector<1x256xf32>
    %4 = vector.extract_strided_slice %0 {offsets = [6, 0], sizes = [1, 256], strides = [1, 1]} : vector<8x256xf32> to vector<1x256xf32>
    %c17_i32 = arith.constant 17 : i32
    %5 = tpu.dynamic_rotate %1 by %c17_i32 dim 1 : vector<4x256xf32>, i32 -> vector<4x256xf32>
    %6 = vector.broadcast %2 : vector<1x256xf32> to vector<4x256xf32>
    %7 = arith.mulf %5, %6 : vector<4x256xf32>
    %8 = vector.broadcast %4 : vector<1x256xf32> to vector<4x256xf32>
    %9 = arith.mulf %7, %8 : vector<4x256xf32>
    %c16_i32 = arith.constant 16 : i32
    %10 = tpu.dynamic_rotate %1 by %c16_i32 dim 1 : vector<4x256xf32>, i32 -> vector<4x256xf32>
    %11 = vector.broadcast %2 : vector<1x256xf32> to vector<4x256xf32>
    %12 = arith.mulf %10, %11 : vector<4x256xf32>
    %c1_i32 = arith.constant 1 : i32
    %13 = tpu.dynamic_rotate %1 by %c1_i32 dim 1 : vector<4x256xf32>, i32 -> vector<4x256xf32>
    %14 = vector.broadcast %4 : vector<1x256xf32> to vector<4x256xf32>
    %15 = arith.mulf %13, %14 : vector<4x256xf32>
    %c241_i32 = arith.constant 241 : i32
    %16 = tpu.dynamic_rotate %1 by %c241_i32 dim 1 : vector<4x256xf32>, i32 -> vector<4x256xf32>
    %17 = vector.broadcast %3 : vector<1x256xf32> to vector<4x256xf32>
    %18 = arith.mulf %16, %17 : vector<4x256xf32>
    %19 = vector.broadcast %4 : vector<1x256xf32> to vector<4x256xf32>
    %20 = arith.mulf %18, %19 : vector<4x256xf32>
    %c240_i32 = arith.constant 240 : i32
    %21 = tpu.dynamic_rotate %1 by %c240_i32 dim 1 : vector<4x256xf32>, i32 -> vector<4x256xf32>
    %22 = vector.broadcast %3 : vector<1x256xf32> to vector<4x256xf32>
    %23 = arith.mulf %21, %22 : vector<4x256xf32>
    %24 = tpu.concatenate %9, %12, %15, %1, %20, %23 in 0 : vector<4x256xf32>, vector<4x256xf32>, vector<4x256xf32>, vector<4x256xf32>, vector<4x256xf32>, vector<4x256xf32> -> vector<24x256xf32>
    %c0_1 = arith.constant 0 : index
    %c0_2 = arith.constant 0 : index
    %25 = vector.load %arg2[%c0_1, %c0_2] : memref<8x24xf32, #tpu.memory_space<vmem>>, vector<8x24xf32>
    %cst = arith.constant dense<0.000000e+00> : vector<8x256xf32>
    %26 = tpu.matmul %25, %24, %cst {dimension_numbers = #tpu.dot_dimension_numbers<[1], [0], [0], [1], [0, 0, 1, 1], [], []>} : vector<8x24xf32>, vector<24x256xf32>, vector<8x256xf32> -> vector<8x256xf32>
    %c0_3 = arith.constant 0 : index
    %c0_4 = arith.constant 0 : index
    %27 = vector.load %arg3[%c0_3, %c0_4] : memref<8x1xf32, #tpu.memory_space<vmem>>, vector<8x1xf32>
    %28 = vector.broadcast %27 : vector<8x1xf32> to vector<8x256xf32>
    %29 = arith.addf %26, %28 : vector<8x256xf32>
    %c0_5 = arith.constant 0 : index
    %c0_6 = arith.constant 0 : index
    %30 = vector.load %arg6[%c0_5, %c0_6] : memref<1x1xf32, #tpu.memory_space<vmem>>, vector<1x1xf32>
    %31 = vector.extract %30[0, 0] : f32 from vector<1x1xf32>
    %c0_7 = arith.constant 0 : index
    %c0_8 = arith.constant 0 : index
    %32 = vector.load %arg4[%c0_7, %c0_8] : memref<8x1xf32, #tpu.memory_space<vmem>>, vector<8x1xf32>
    %c0_9 = arith.constant 0 : index
    %c0_10 = arith.constant 0 : index
    %33 = vector.load %arg5[%c0_9, %c0_10] : memref<8x1xf32, #tpu.memory_space<vmem>>, vector<8x1xf32>
    %34 = vector.shape_cast %29 : vector<8x256xf32> to vector<1x8x256xf32>
    %cst_11 = arith.constant dense<0.000000e+00> : vector<1xf32>
    %35 = vector.multi_reduction <add>, %34, %cst_11 [1, 2] : vector<1x8x256xf32> to vector<1xf32>
    %36 = vector.shape_cast %35 : vector<1xf32> to vector<1x1x1xf32>
    %37 = vector.extract %36[0, 0, 0] : f32 from vector<1x1x1xf32>
    %38 = arith.mulf %29, %29 : vector<8x256xf32>
    %39 = vector.shape_cast %38 : vector<8x256xf32> to vector<1x8x256xf32>
    %cst_12 = arith.constant dense<0.000000e+00> : vector<1xf32>
    %40 = vector.multi_reduction <add>, %39, %cst_12 [1, 2] : vector<1x8x256xf32> to vector<1xf32>
    %41 = vector.shape_cast %40 : vector<1xf32> to vector<1x1x1xf32>
    %42 = vector.extract %41[0, 0, 0] : f32 from vector<1x1x1xf32>
    %cst_13 = arith.constant 4.8828125E-4 : f32
    %43 = arith.mulf %37, %cst_13 : f32
    %cst_14 = arith.constant 4.8828125E-4 : f32
    %44 = arith.mulf %42, %cst_14 : f32
    %45 = arith.mulf %43, %43 : f32
    %46 = arith.subf %44, %45 : f32
    %cst_15 = arith.constant 0.000000e+00 : f32
    %47 = arith.maximumf %46, %cst_15 : f32
    %cst_16 = arith.constant 9.99999993E-9 : f32
    %48 = arith.addf %47, %cst_16 : f32
    %49 = math.rsqrt %48 : f32
    %50 = vector.broadcast %49 : f32 to vector<8x1xf32>
    %51 = arith.mulf %32, %50 : vector<8x1xf32>
    %52 = vector.broadcast %43 : f32 to vector<8x1xf32>
    %53 = arith.mulf %52, %51 : vector<8x1xf32>
    %54 = arith.subf %33, %53 : vector<8x1xf32>
    %55 = vector.broadcast %51 : vector<8x1xf32> to vector<8x256xf32>
    %56 = arith.mulf %29, %55 : vector<8x256xf32>
    %57 = vector.broadcast %54 : vector<8x1xf32> to vector<8x256xf32>
    %58 = arith.addf %56, %57 : vector<8x256xf32>
    %cst_17 = arith.constant 0.000000e+00 : f32
    %59 = vector.broadcast %cst_17 : f32 to vector<8x256xf32>
    %60 = arith.cmpf oge, %58, %59 : vector<8x256xf32>
    %61 = vector.broadcast %31 : f32 to vector<8x256xf32>
    %62 = arith.mulf %61, %58 : vector<8x256xf32>
    %63 = arith.select %60, %58, %62 : vector<8x256xi1>, vector<8x256xf32>
    %c0_18 = arith.constant 0 : index
    %c0_19 = arith.constant 0 : index
    %64 = vector.load %arg7[%c0_18, %c0_19] : memref<8x256xf32, #tpu.memory_space<vmem>>, vector<8x256xf32>
    tpu.vector_store %arg7[%c0_18, %c0_19], %63 {strides = array<i32>} : memref<8x256xf32, #tpu.memory_space<vmem>>, vector<8x256xf32>,
    return
  }
  func.func @transform_0(%arg0: i32) -> (i32, i32) {
    %c0_i32 = arith.constant 0 : i32
    %c0_i32_0 = arith.constant 0 : i32
    return %c0_i32, %arg0 : i32, i32
  }
  func.func @transform_1(%arg0: i32) -> (i32, i32) {
    %c0_i32 = arith.constant 0 : i32
    %c0_i32_0 = arith.constant 0 : i32
    %c0_i32_1 = arith.constant 0 : i32
    return %c0_i32, %c0_i32_0 : i32, i32
  }
  func.func @transform_2(%arg0: i32) -> (i32, i32) {
    %c0_i32 = arith.constant 0 : i32
    %c0_i32_0 = arith.constant 0 : i32
    %c0_i32_1 = arith.constant 0 : i32
    return %c0_i32, %c0_i32_0 : i32, i32
  }
  func.func @transform_3(%arg0: i32) -> (i32, i32) {
    %c0_i32 = arith.constant 0 : i32
    %c0_i32_0 = arith.constant 0 : i32
    %c0_i32_1 = arith.constant 0 : i32
    return %c0_i32, %c0_i32_0 : i32, i32
  }
  func.func @transform_4(%arg0: i32) -> (i32, i32) {
    %c0_i32 = arith.constant 0 : i32
    %c0_i32_0 = arith.constant 0 : i32
    %c0_i32_1 = arith.constant 0 : i32
    return %c0_i32, %c0_i32_0 : i32, i32
  }
  func.func @transform_5(%arg0: i32) -> (i32, i32) {
    %c0_i32 = arith.constant 0 : i32
    %c0_i32_0 = arith.constant 0 : i32
    %c0_i32_1 = arith.constant 0 : i32
    return %c0_i32, %c0_i32_0 : i32, i32
  }
  func.func @transform_6(%arg0: i32) -> (i32, i32) {
    %c0_i32 = arith.constant 0 : i32
    %c0_i32_0 = arith.constant 0 : i32
    return %c0_i32, %arg0 : i32, i32
  }
}

</mosaic_0001>

<bundles_post_ra>
// kernel: tpu_custom_call.1
= control target key start
LH: loop header
LB: loop body
LE: loop exit
PB: predicated region body
PF: predicated region fallthrough
CT: control target
= control target key end

     0   :  { %s968_s0 = inlined_call_operand.hbm [shape: f32[8,512], index: 0, kind: input, shape index: {}]   ;;  %s969_s1 = inlined_call_operand.vmem [shape: f32[8,24], index: 1, kind: input, shape index: {}]   ;;  %s970_s2 = inlined_call_operand.vmem [shape: f32[8,1], index: 2, kind: input, shape index: {}]   ;;  %s971_s3 = inlined_call_operand.vmem [shape: f32[8,1], index: 3, kind: input, shape index: {}]   ;;  %s972_s4 = inlined_call_operand.vmem [shape: f32[8,1], index: 4, kind: input, shape index: {}]   ;;  %s973_s5 = inlined_call_operand.<no memory space> [shape: f32[1,1], index: 5, kind: input, shape index: {}]   ;;  %s974_s6 = inlined_call_operand.hbm [shape: f32[8,512], index: 6, kind: output, shape index: {}]  }
   0x1   :  { %v11_v0 = vstv %s973_s5 }
   0x2   :  { %12 = vst [vmem:[#allocation2] sm:$0x1] %v11_v0 }
   0x3   :  { %13 = vsyncpa [#allocation4], 0 }
   0x4   :  { %15 = vsyncpa [#allocation4 + $0x1], 0 }
   0x5   :  { %16 = vsyncpa [#allocation5], 0 }
   0x6   :  { %18 = vsyncpa [#allocation5 + $0x1], 0  ;;  %s794_s23 = smov 0   ;;  %s796_s24 = smov 0  }
   0x7   :  { %s798_s25 = smov 0   ;;  %s800_s26 = smov 0  }
   0x8 LB: > { %s815_s5 = sadd.s32 4294967295, %s747_s26   ;;  %s568_s27 = sadd.s32 4294967294, %s747_s26   ;;  %s747_s26 = sphi %s800_s26, %s984_s26   ;;  %s743_s25 = sphi %s798_s25, %s983_s25   ;;  %s739_s24 = sphi %s796_s24, %s982_s24   ;;  %s735_s23 = sphi %s794_s23, %s981_s23  }
   0x9   : > { %s819_s28 = sadd.s32 1, %s747_s26   ;;  %s31_s29 = sadd.s32 1, %s743_s25 }
   0xa   : > { %s28_s30 = ssub.s32 %s747_s26, %s819_s28  ;;  %p38_p0 = scmp.ne.s32.totalorder %s743_s25, %s739_s24 }
   0xb   : > { %p29_p1 = scmp.eq.s32.totalorder %s28_s30, 0  ;;  %p39_p2 = scmp.eq.s32.totalorder %s747_s26, 0 }
   0xc   : > { %p44_p3 = scmp.ne.s32.totalorder %s739_s24, %s735_s23  ;;  %p45_p4 = scmp.eq.s32.totalorder %s815_s5, 0 }
   0xd   : > { %s831_s7 = scalar_select %p29_p1, %s743_s25, %s31_s29  }
   0xe   : > { %p833_p5 = por %p39_p2, %p38_p0  ;;  %p837_p6 = por %p45_p4, %p44_p3 }
   0xf   : > { %p173_p7 = scmp.eq.s32.totalorder %s815_s5, 1  ;;  %p179_p8 = scmp.eq.s32.totalorder %s568_s27, 1 }
  0x10   : > { %p606_p10 = scmp.lt.s32.totalorder %s747_s26, 2  ;;  %s214_s12 = sand.u32 1, %s743_s25  }
  0x11   : > { %p844_p11 = por %p173_p7, %p38_p0  ;;  %p848_p12 = por %p179_p8, %p44_p3 }
  0x12   : > { %s584_s13 = sshll.u32 %s747_s26, 4  ;;  %s571_s14 = sshll.u32 %s214_s12, 4 }
  0x13   : > { %s223_s17 = scalar_lea.hbm %s968_s0, %s584_s13  ;;  %s218_s19 = scalar_lea.vmem [#allocation3], %s571_s14 }
  0x14   : > { %s225_s18 = sshll.u32 %s223_s17, 4  ;;  %s227_s20 = sshll.u32 %s218_s19, 4  ;;  %s226_s18 = int_to_ptr.hbm [resolvable:$true] %s225_s18  ;;  %s228_s20 = int_to_ptr.vmem [resolvable:$true] %s227_s20 }
  0x15   : > { %p859_p13 = pnand %p606_p10, %p833_p5  ;;  %p574_p0 = scmp.ge.s32.totalorder %s747_s26, 1 }
  0x16   : > { %p232_p1 = scmp.lt.s32.totalorder %s747_s26, 3  ;;  %s215_s22 = scalar_lea.sflag [#allocation4], %s214_s12 }
  0x17   : > { %s651_s27 = sshra.s32 %s226_s18, 4  ;;  %p655_p3 = pneg %p859_p13  ;;  %s652_s27 = int_to_ptr.hbm [resolvable:$true] %s651_s27 }
  0x18   : > { %s653_s29 = scalar_lea.hbm %s652_s27, 16  ;;  %s658_s8 = scalar_lea.hbm %s968_s0, 32 }
  0x19   : > { %p654_p2 = scmp.ne.s32.totalorder %s652_s27, %s653_s29  ;;  %p659_p5 = scmp.lt.s32.totalorder %s652_s27, %s968_s0 }
  0x1a   : > { %p660_p8 = scmp.lt.s32.totalorder %s658_s8, %s653_s29 }
  0x1b   : > { %p656_p4 = pnand %p655_p3, %p654_p2 }
  0x1c   : > { %p661_p10 = por %p660_p8, %p659_p5 }
  0x1d   : > { %p657_p7 = pneg %p656_p4 }
  0x1f   : > { %p662_p9 = pnand %p661_p10, %p657_p7 }
  0x21   : > { %665 = shalt.err (!%p662_p9)
}
  0x22   : > { %601 = dma.hbm_to_vmem [thread:$0]  (!%p859_p13), %s226_s18, 256, %s228_s20, %s215_s22  }
  0x23   : > { %p233_p2 = pnand %p574_p0, %p232_p1 }
  0x24   : > { %s880_s12 = sand.u32 (!%p233_p2), 1, %s739_s24  }
  0x25   : > { %236 = sbr.rel (%p233_p2) target bundleno = 712 (0x2c8), region = 44  ;;  %s575_s16 = sshll.u32 (!%p233_p2), %s880_s12, 4 }
  0x26   : > { %s239_s17 = scalar_lea.sflag (!%p233_p2), [#allocation4], %s880_s12  ;;  %s242_s19 = scalar_lea.vmem (!%p233_p2), [#allocation3], %s575_s16 }
  0x2a   : > { %726 = dma.done.wait (%p837_p6), %s239_s17, 256  }
  0x2b   : > { %728 = vsyncadd (%p837_p6), %s239_s17, 4294967040  ;;  %v890_v1 = vld [vmem:[%s242_s19] sm:$0xff]  ;;  %s749_s18 = smov 112   ;;  %s750_s20 = smov 113   ;;  %v895_v2 = vld [vmem:[%s242_s19 + $0x8] sm:$0xff]  ;;  %v280_v3 = vlaneseq  ;;  %v754_v7 = vmov 0  }
  0x2c   : > { %324 = vrot.lane.b32.xlu1 %v890_v1, %s749_s18  ;;  %311 = vrot.lane.b32.xlu0 %v890_v1, %s750_s20  ;;  %s751_s21 = smov 17   ;;  %s752_s9 = smov 16   ;;  %v359_v6 = vld [vmem:[%s970_s2] sm:$0xff]  ;;  %v319_v10 = vperm.slane %v895_v2, 5  ;;  %v318_v11 = vperm.slane %v890_v1, 5  ;;  %v290_v12 = vperm.slane %v895_v2, 6 }
  0x2d   : > { %276 = vrot.lane.b32.xlu2 %v890_v1, %s751_s21  ;;  %s753_s22 = smov 1   ;;  %647 = vset.pattern.permute.xlu1 %v754_v7  ;;  %v281_v8 = vand.u32 127, %v280_v3  ;;  %v289_v13 = vperm.slane %v890_v1, 6  ;;  %vm351_vm2 = vcmask 1043456   ;;  %v286_v35 = vperm.slane %v895_v2, 4  ;;  %v358_v57 = vld [vmem:[%s969_s1] sm:$0xff] }
  0x2e   : > { %648 = vset.pattern.permute.xlu0 %v754_v7  ;;  %v285_v36 = vperm.slane %v890_v1, 4  ;;  %v341_v45 = vrot.slane %v890_v1, 4  ;;  %v342_v46 = vrot.slane %v895_v2, 4  ;;  %vm365_vm6 = vcmask 195584   ;;  %s701_s29 = scalar_lea.hbm %s974_s6, 32 }
  0x2f   : > { %vm328_vm0 = vcmp.lt.s32.totalorder %v281_v8, 112  ;;  %vm315_vm1 = vcmp.lt.s32.totalorder %v281_v8, 113  ;;  %vm297_vm3 = vcmp.lt.s32.totalorder %v281_v8, 16  ;;  %vm282_vm4 = vcmp.lt.s32.totalorder %v281_v8, 17 }
  0x30   : > { %vm306_vm5 = vcmp.lt.s32.totalorder %v281_v8, 1 }
  0x34   : > { %326 = vrot.lane.b32.xlu1 %v895_v2, %s749_s18  ;;  %313 = vrot.lane.b32.xlu0 %v895_v2, %s750_s20 }
  0x35   : > { %278 = vrot.lane.b32.xlu2 %v895_v2, %s751_s21  ;;  %s755_s21 = smov 0.0  }
  0x3c   : > { %295 = vrot.lane.b32.xlu1 %v895_v2, %s752_s9  ;;  %293 = vrot.lane.b32.xlu0 %v890_v1, %s752_s9 }
  0x3d   : > { %302 = vrot.lane.b32.xlu2 %v890_v1, %s753_s22 }
  0x44   : > { %304 = vrot.lane.b32.xlu0 %v895_v2, %s753_s22  ;;  %362 = vperm.xlu1 %647, %v359_v6  }
  0x87   : > { %v277_v9 = vpop.permute.xlu2 %276 }
  0x8f   : > { %v279_v28 = vpop.permute.xlu2 %278 }
  0x90   : > { %v283_v37 = vsel %vm282_vm4, %v277_v9, %v279_v28  ;;  %v284_v38 = vsel %vm282_vm4, %v279_v28, %v277_v9  ;;  %v411_v28 = vld [vmem:[%s971_s3] sm:$0xff] }
  0x91   : > { %v287_v42 = vmul.f32 %v285_v36, %v284_v38  ;;  %v288_v43 = vmul.f32 %v286_v35, %v283_v37 }
  0x93   : > { %v291_v53 = vmul.f32 %v289_v13, %v287_v42  ;;  %v292_v54 = vmul.f32 %v290_v12, %v288_v43 }
  0x97   : > { %v303_v41 = vpop.permute.xlu2 %302 }
  0x9e   : > { %v325_v4 = vpop.permute.xlu1 %324  ;;  %v312_v5 = vpop.permute.xlu0 %311 }
  0xa6   : > { %v327_v14 = vpop.permute.xlu1 %326  ;;  %v314_v15 = vpop.permute.xlu0 %313 }
  0xa7   : > { %v329_v16 = vsel %vm328_vm0, %v325_v4, %v327_v14  ;;  %v330_v17 = vsel %vm328_vm0, %v327_v14, %v325_v4  ;;  %v316_v18 = vsel %vm315_vm1, %v312_v5, %v314_v15  ;;  %v317_v19 = vsel %vm315_vm1, %v314_v15, %v312_v5  ;;  %v409_v5 = vld [vmem:[#allocation2] sm:$0x1] }
  0xa8   : > { %v331_v20 = vmul.f32 %v329_v16, %v318_v11  ;;  %v332_v21 = vmul.f32 %v330_v17, %v319_v10  ;;  %v320_v22 = vmul.f32 %v318_v11, %v316_v18  ;;  %v321_v23 = vmul.f32 %v319_v10, %v317_v19  ;;  %586 = vpush %v409_v5 }
  0xaa   : > { %v347_v24 = vrot.slane %v331_v20, 4  ;;  %v348_v25 = vrot.slane %v332_v21, 4  ;;  %v322_v26 = vmul.f32 %v320_v22, %v289_v13  ;;  %v323_v27 = vmul.f32 %v321_v23, %v290_v12 }
  0xac   : > { %v356_v29 = vsel %vm351_vm2, %v322_v26, %v347_v24  ;;  %v357_v30 = vsel %vm351_vm2, %v323_v27, %v348_v25 }
  0xad   : > { %382 = vmatpush.msra.mxu0 %v356_v29  ;;  %402 = vmatpush.msra.mxu1 %v357_v30 }
  0xae   : > { %v296_v31 = vpop.permute.xlu1 %295  ;;  %v294_v32 = vpop.permute.xlu0 %293 }
  0xaf   : > { %v298_v33 = vsel %vm297_vm3, %v294_v32, %v296_v31  ;;  %v299_v34 = vsel %vm297_vm3, %v296_v31, %v294_v32 }
  0xb0   : > { %v300_v39 = vmul.f32 %v299_v34, %v285_v36  ;;  %v301_v40 = vmul.f32 %v298_v33, %v286_v35  ;;  %v412_v33 = vld [vmem:[%s972_s4] sm:$0xff] }
  0xb2   : > { %v335_v49 = vrot.slane %v300_v39, 4  ;;  %v336_v50 = vrot.slane %v301_v40, 4 }
  0xb4   : > { %v352_v58 = vsel %vm351_vm2, %v291_v53, %v335_v49  ;;  %v353_v59 = vsel %vm351_vm2, %v292_v54, %v336_v50 }
  0xb6   : > { %v305_v44 = vpop.permute.xlu0 %304  ;;  %v363_v60 = vpop.permute.xlu1 %362 }
  0xb7   : > { %v307_v47 = vsel %vm306_vm5, %v303_v41, %v305_v44  ;;  %v308_v48 = vsel %vm306_vm5, %v305_v44, %v303_v41 }
  0xb8   : > { %v309_v51 = vmul.f32 %v308_v48, %v289_v13  ;;  %v310_v52 = vmul.f32 %v307_v47, %v290_v12 }
  0xba   : > { %v354_v55 = vsel %vm351_vm2, %v309_v51, %v341_v45  ;;  %v355_v56 = vsel %vm351_vm2, %v310_v52, %v342_v46 }
  0xbb   : > { %383 = vmatpush.msra.mxu0 %v354_v55  ;;  %403 = vmatpush.msra.mxu1 %v355_v56 }
  0xbd   : > { %384 = vmatpush.msra.mxu0 %v352_v58  ;;  %404 = vmatpush.msra.mxu1 %v353_v59 }
  0xbe   : > { %577 = vmatmul.msk.f32.vlgmr.msra.gmra.mxu0 %vm365_vm6, %v358_v57  ;;  %578 = vmatmul.msk.f32.vlgmr.msra.gmra.mxu1 %vm365_vm6, %v358_v57 }
  0xd9   : > { %s924_s8 = spop %586 }
  0xda   : > { %v474_v41 = vstv %s924_s8 }
 0x13b   : > { %v386_v61 = vpop.f32.mrf.mxu0  ;;  %v406_v62 = vpop.f32.mrf.mxu1 }
 0x13c   : > { %v387_v63 = vadd.f32 %v386_v61, %v363_v60  ;;  %v407_v0 = vadd.f32 %v406_v62, %v363_v60 }
 0x13e   : > { %v413_v1 = vadd.f32 %v407_v0, %v387_v63  ;;  %v423_v2 = vmul.f32 %v387_v63, %v387_v63  ;;  %v424_v3 = vmul.f32 %v407_v0, %v407_v0 }
 0x140   : > { %414 = vadd.xlane.f32.xlu2 %v413_v1  ;;  %v425_v4 = vadd.f32 %v424_v3, %v423_v2 }
 0x142   : > { %426 = vadd.xlane.f32.xlu0 %v425_v4 }
 0x1b3   : > { %v415_v6 = vpop.xlane.xlu2 %414 }
 0x1b4   : > { %v416_v7 = vrot.slane %v415_v6, 4 }
 0x1b5   : > { %v427_v8 = vpop.xlane.xlu0 %426 }
 0x1b6   : > { %v417_v9 = vadd.f32 %v416_v7, %v415_v6  ;;  %v428_v10 = vrot.slane %v427_v8, 4 }
 0x1b8   : > { %v418_v11 = vrot.slane %v417_v9, 2  ;;  %v429_v12 = vadd.f32 %v428_v10, %v427_v8 }
 0x1ba   : > { %v419_v13 = vadd.f32 %v418_v11, %v417_v9  ;;  %v430_v14 = vrot.slane %v429_v12, 2 }
 0x1bc   : > { %v431_v15 = vadd.f32 %v430_v14, %v429_v12  ;;  %v420_v16 = vrot.slane %v419_v13, 1 }
 0x1be   : > { %v421_v17 = vadd.f32 %v420_v16, %v419_v13  ;;  %v432_v18 = vrot.slane %v431_v15, 1 }
 0x1c0   : > { %588 = vpush %v421_v17  ;;  %v433_v19 = vadd.f32 %v432_v18, %v431_v15 }
 0x1c2   : > { %590 = vpush %v433_v19 }
 0x1f1   : > { %s589_s14 = spop %588 }
 0x1f2   : > { %s435_s15 = smul.f32 0.00048828125, %s589_s14 }
 0x1f3   : > { %s591_s17 = spop %590 }
 0x1f4   : > { %s437_s19 = smul.f32 %s435_s15, %s435_s15  ;;  %v455_v31 = vstv %s435_s15  ;;  %s271_s15 = scalar_lea.vmem [#allocation6], %s575_s16 }
 0x1f5   : > { %s436_s18 = smul.f32 0.00048828125, %s591_s17  ;;  %s585_s17 = sshll.u32 %s815_s5, 4 }
 0x1f6   : > { %s482_s5 = scalar_lea.sflag [#allocation5], %s880_s12 }
 0x1f7   : > { %s438_s20 = ssub.f32 %s436_s18, %s437_s19 }
 0x1f9   : > { %s439_s9 = smax.f32 %s755_s21, %s438_s20  ;;  %s493_s20 = scalar_lea.hbm %s974_s6, %s585_s17 }
 0x1fa   : > { %s440_s22 = sadd.f32 1e-08, %s439_s9  ;;  %s495_s21 = sshll.u32 %s271_s15, 4  ;;  %s496_s21 = int_to_ptr.vmem [resolvable:$true] %s495_s21 }
 0x1fb   : > { %s497_s9 = sshll.u32 %s493_s20, 4  ;;  %s498_s9 = int_to_ptr.hbm [resolvable:$true] %s497_s9 }
 0x1fc   : > { %v441_v20 = vstv %s440_s22  ;;  %s695_s22 = sshra.s32 %s498_s9, 4  ;;  %s696_s22 = int_to_ptr.hbm [resolvable:$true] %s695_s22 }
 0x1fd   : > { %649 = vrsqrt.f32 %v441_v20  ;;  %vm448_vm8 = vweird.f32 %v441_v20  ;;  %s697_s27 = scalar_lea.hbm %s696_s22, 16  ;;  %p702_p0 = scmp.lt.s32.totalorder %s696_s22, %s974_s6 }
 0x1fe   : > { %p698_p6 = scmp.ne.s32.totalorder %s696_s22, %s697_s27  ;;  %p703_p1 = scmp.lt.s32.totalorder %s701_s29, %s697_s27 }
 0x200   : > { %p699_p9 = pnand %p698_p6, %p844_p11  ;;  %p704_p3 = por %p703_p1, %p702_p0 }
 0x202   : > { %p700_p13 = pneg %p699_p9 }
 0x203   : > { %v650_v21 = vpop.eup %649 }
 0x204   : > { %v443_v22 = vmul.f32 %v650_v21, %v441_v20  ;;  %vm449_vm7 = vweird.f32 %v650_v21  ;;  %p705_p4 = pnand %p704_p3, %p700_p13 }
 0x205   : > { %vm450_vm9 = vmor %vm448_vm8, %vm449_vm7 }
 0x206   : > { %v444_v23 = vmul.f32 %v650_v21, %v443_v22 }
 0x208   : > { %v445_v24 = vmul.f32 0.5, %v444_v23 }
 0x20a   : > { %v446_v25 = vsub.f32 1.5, %v445_v24 }
 0x20c   : > { %v447_v26 = vmul.f32 %v650_v21, %v446_v25 }
 0x20e   : > { %v451_v27 = vsel %vm450_vm9, %v650_v21, %v447_v26 }
 0x20f   : > { %592 = vpush %v451_v27 }
 0x240   : > { %s593_s30 = spop %592 }
 0x241   : > { %v453_v29 = vstv %s593_s30 }
 0x242   : > { %v454_v30 = vmul.f32 %v453_v29, %v411_v28 }
 0x244   : > { %460 = vperm.xlu1 %647, %v454_v30   ;;  %v456_v32 = vmul.f32 %v455_v31, %v454_v30 }
 0x246   : > { %v457_v34 = vsub.f32 %v412_v33, %v456_v32 }
 0x24c   : > { %467 = vperm.xlu1 %647, %v457_v34  }
 0x2b6   : > { %v461_v35 = vpop.permute.xlu1 %460 }
 0x2b7   : > { %v463_v36 = vmul.f32 %v461_v35, %v387_v63  ;;  %v464_v37 = vmul.f32 %v461_v35, %v407_v0 }
 0x2be   : > { %v468_v38 = vpop.permute.xlu1 %467 }
 0x2bf   : > { %v470_v39 = vadd.f32 %v468_v38, %v463_v36  ;;  %v471_v40 = vadd.f32 %v468_v38, %v464_v37 }
 0x2c1   : > { %vm472_vm10 = vcmp.ge.f32.partialorder %v470_v39, 0.0  ;;  %vm473_vm11 = vcmp.ge.f32.partialorder %v471_v40, 0.0  ;;  %v475_v42 = vmul.f32 %v474_v41, %v470_v39  ;;  %v476_v43 = vmul.f32 %v474_v41, %v471_v40 }
 0x2c3   : > { %v477_v44 = vsel %vm472_vm10, %v470_v39, %v475_v42  ;;  %v478_v45 = vsel %vm473_vm11, %v471_v40, %v476_v43 }
 0x2c4   : > { %479 = vst [vmem:[%s271_s15] sm:$0xff] %v477_v44 }
 0x2c5   : > { %480 = vst [vmem:[%s271_s15 + $0x8] sm:$0xff] %v478_v45 }
 0x2c6   : > { %708 = shalt.err (!%p705_p4)
}
 0x2c7   : > { %596 = dma.vmem_to_hbm [thread:$0]  (%p844_p11), %s496_s21, 256, %s498_s9, %s482_s5  }
 0x2c8 PF: > { %s509_s12 = sand.u32 1, %s735_s23   ;;  %p980_p7 = scmp.ge.s32.totalorder %s747_s26, 2 }
 0x2c9   : > { %s510_s14 = scalar_lea.sflag [#allocation5], %s509_s12 }
 0x2ca   : > { %p603_p5 = pnand %p980_p7, %p848_p12 }
 0x2cc   : > { %p604_p8 = pneg %p603_p5 }
 0x2ce   : > { %730 = dma.done.wait (%p604_p8), %s510_s14, 256  }
 0x2cf   : > { %732 = vsyncadd (%p604_p8), %s510_s14, 4294967040  ;;  %p21_p10 = scmp.ge.s32.totalorder %s819_s28, 4   ;;  %s981_s23 = smov %s739_s24 }
 0x2d0   : > { %s982_s24 = smov %s743_s25  ;;  %s983_s25 = smov %s831_s7 }
 0x2d1   : > { %s984_s26 = smov %s819_s28  ;;  %23 = sbr.rel (!%p21_p10) target bundleno = 8 (0x8), region = 89 }
 0x2d6   :  { %516 = vsyncpa [#allocation4], 1 }
 0x2d7   :  { %518 = vsyncpa [#allocation4 + $0x1], 1 }
 0x2d8   :  { %519 = vsyncpa [#allocation5], 1 }
 0x2d9   :  { %521 = vsyncpa [#allocation5 + $0x1], 1 }

</bundles_post_ra>
